<compile_context>
chip_gen: v7x
topology: tpu7x:2x2x1
jax: 0.10.0
libtpu: 0.0.40
codegen_flags: <defaults>
</compile_context>

<pallas_src>
import functools
import math

import jax
import jax.numpy as jnp
from jax import lax
from jax.experimental import pallas as pl
from jax.experimental.pallas import tpu as pltpu


# Scoped-VMEM limit safe on every generation (v5e/v6e 128 MiB physical,
# v7x 64 MiB). Tiles below stay well under this; raise further on v5e/v6e
# only if tiles are grown.
_VMEM_LIMIT_BYTES = 32 * 1024 * 1024


def _pick_tile(dim, candidates):
    """Largest candidate that evenly divides `dim`; else the full dim.

    Full-dim blocks are always legal (the (8,128) rule only applies to blocks
    smaller than the array), so the small demo shapes fall back to one block
    while production GPT shapes get 128/256/512-aligned tiles.
    """
    for c in candidates:
        if dim >= c and dim % c == 0:
            return c
    return dim


# ---------------------------------------------------------------------------
# Tiled linear:  y = x @ W.T + b   (x: (M,K), W: (N,K) PyTorch layout, b: (N,))
# ---------------------------------------------------------------------------

def _linear_kernel(x_ref, w_ref, b_ref, o_ref, acc_ref):
    # x_ref: (tm, tk), w_ref: (tn, tk), b_ref: (1, tn), o_ref: (tm, tn)
    @pl.when(pl.program_id(2) == 0)
    def _init():
        acc_ref[...] = jnp.zeros_like(acc_ref)

    # Contract the K dim of both operands directly — no in-kernel transpose,
    # no transposed weight copy; MXU accumulates in f32.
    acc_ref[...] += lax.dot_general(
        x_ref[...], w_ref[...],
        dimension_numbers=(((1,), (1,)), ((), ())),
        preferred_element_type=jnp.float32,
    )

    @pl.when(pl.program_id(2) == pl.num_programs(2) - 1)
    def _store():
        o_ref[...] = (acc_ref[...] + b_ref[...].astype(jnp.float32)).astype(o_ref.dtype)


def linear_pallas(x2d, w, b, *, tm_caps=(256, 128), tn_caps=(256, 128),
                  tk_caps=(512, 256, 128)):
    """y = x2d @ w.T + b with x2d (M, K), w (N, K), b (N,).

    Default tile caps target the 256-wide MXU (v6e / v7x); pass (128,) caps
    for v5e's 128-wide MXU.
    """
    M, K = x2d.shape
    N, K2 = w.shape
    assert K == K2
    tm = _pick_tile(M, tm_caps)
    tn = _pick_tile(N, tn_caps)
    tk = _pick_tile(K, tk_caps)
    grid = (M // tm, N // tn, K // tk)  # K innermost -> accumulator stays resident
    return pl.pallas_call(
        _linear_kernel,
        out_shape=jax.ShapeDtypeStruct((M, N), x2d.dtype),
        grid=grid,
        in_specs=[
            pl.BlockSpec((tm, tk), lambda i, j, k: (i, k)),
            pl.BlockSpec((tn, tk), lambda i, j, k: (j, k)),
            pl.BlockSpec((1, tn), lambda i, j, k: (0, j)),
        ],
        out_specs=pl.BlockSpec((tm, tn), lambda i, j, k: (i, j)),
        scratch_shapes=[pltpu.VMEM((tm, tn), jnp.float32)],
        compiler_params=pltpu.CompilerParams(
            dimension_semantics=("parallel", "parallel", "arbitrary"),
            vmem_limit_bytes=_VMEM_LIMIT_BYTES,
        ),
    )(x2d, w, b.reshape(1, N))


# ---------------------------------------------------------------------------
# Flash-style causal attention:  q, k, v (BH, T, D) -> (BH, T, D)
# ---------------------------------------------------------------------------

def _flash_attn_kernel(q_ref, k_ref, v_ref, o_ref, m_ref, l_ref, acc_ref,
                       *, scale, tq, tkv):
    qi = pl.program_id(1)
    ki = pl.program_id(2)

    @pl.when(ki == 0)
    def _init():
        m_ref[...] = jnp.full_like(m_ref, -jnp.inf)
        l_ref[...] = jnp.zeros_like(l_ref)
        acc_ref[...] = jnp.zeros_like(acc_ref)

    def run_block(apply_mask):
        # Native-dtype matmul (bf16 stays bf16 on the MXU), f32 accumulation.
        s = lax.dot_general(
            q_ref[...], k_ref[...],
            dimension_numbers=(((1,), (1,)), ((), ())),
            preferred_element_type=jnp.float32,
        ) * scale                                            # (tq, tkv)
        if apply_mask:  # only on diagonal-straddling tiles
            row = qi * tq + lax.broadcasted_iota(jnp.int32, s.shape, 0)
            col = ki * tkv + lax.broadcasted_iota(jnp.int32, s.shape, 1)
            s = jnp.where(col <= row, s, -jnp.inf)

        m_prev = m_ref[...]
        m_new = jnp.maximum(m_prev, jnp.max(s, axis=-1, keepdims=True))
        alpha = jnp.exp(m_prev - m_new)                      # 0 on first visit
        p = jnp.exp(s - m_new)
        l_ref[...] = alpha * l_ref[...] + jnp.sum(p, axis=-1, keepdims=True)
        acc_ref[...] = alpha * acc_ref[...] + jnp.dot(
            p.astype(v_ref.dtype), v_ref[...],
            preferred_element_type=jnp.float32)
        m_ref[...] = m_new

    # Causal tile classification.
    kv_lo = ki * tkv
    kv_hi = ki * tkv + (tkv - 1)
    q_lo = qi * tq
    q_hi = qi * tq + (tq - 1)
    below_diag = kv_hi <= q_lo          # tile fully visible -> no mask needed
    has_work = kv_lo <= q_hi            # at least one unmasked element
    straddles = jnp.logical_and(has_work, jnp.logical_not(below_diag))

    @pl.when(below_diag)
    def _full_tile():
        run_block(apply_mask=False)

    @pl.when(straddles)
    def _diag_tile():
        run_block(apply_mask=True)

    @pl.when(ki == pl.num_programs(2) - 1)
    def _finalize():
        inv_l = pl.reciprocal(l_ref[...], approx=True)       # EUP slot
        o_ref[...] = (acc_ref[...] * inv_l).astype(o_ref.dtype)


def flash_attention(q, k, v, *, tq_caps=(256, 128), tkv_caps=(256, 128)):
    """Causal softmax attention: q, k, v (BH, T, D) -> (BH, T, D)."""
    BH, T, D = q.shape
    tq = _pick_tile(T, tq_caps)
    tkv = _pick_tile(T, tkv_caps)
    grid = (BH, T // tq, T // tkv)
    kernel = functools.partial(
        _flash_attn_kernel, scale=1.0 / math.sqrt(D), tq=tq, tkv=tkv)
    q_spec = pl.BlockSpec((None, tq, D), lambda b, qi, ki: (b, qi, 0))
    kv_spec = pl.BlockSpec((None, tkv, D), lambda b, qi, ki: (b, ki, 0))
    # Note: last block dim is head_dim (< 128 for typical GPT heads); for
    # production sizes fold 2 heads per block or pad D to 128 for lane-dense
    # stores.
    return pl.pallas_call(
        kernel,
        out_shape=jax.ShapeDtypeStruct((BH, T, D), q.dtype),
        grid=grid,
        in_specs=[q_spec, kv_spec, kv_spec],
        out_specs=pl.BlockSpec((None, tq, D), lambda b, qi, ki: (b, qi, 0)),
        scratch_shapes=[
            pltpu.VMEM((tq, 1), jnp.float32),   # running max
            pltpu.VMEM((tq, 1), jnp.float32),   # running denominator
            pltpu.VMEM((tq, D), jnp.float32),   # output accumulator
        ],
        compiler_params=pltpu.CompilerParams(
            dimension_semantics=("parallel", "parallel", "arbitrary"),
            vmem_limit_bytes=_VMEM_LIMIT_BYTES,
        ),
    )(q, k, v)


# ---------------------------------------------------------------------------
# Module wrapper
# ---------------------------------------------------------------------------

def causal_self_attention(x, params, n_head):
    """Forward pass of CausalSelfAttention. x: (B, T, C)."""
    B, T, C = x.shape
    H = n_head
    D = C // H
    x2d = x.reshape(B * T, C)

    # Fused QKV projection: one tiled pallas_call, x read from HBM once.
    w_qkv = jnp.concatenate([params["Wq"], params["Wk"], params["Wv"]], axis=0)  # (3C, C)
    b_qkv = jnp.concatenate([params["bq"], params["bk"], params["bv"]], axis=0)  # (3C,)
    qkv = linear_pallas(x2d, w_qkv, b_qkv)                    # (B*T, 3C)

    # Single transpose for the head split of all three tensors:
    # (B, T, 3, H, D) -> (3, B, H, T, D)
    qkv = qkv.reshape(B, T, 3, H, D).transpose(2, 0, 3, 1, 4)
    q = qkv[0].reshape(B * H, T, D)
    k = qkv[1].reshape(B * H, T, D)
    v = qkv[2].reshape(B * H, T, D)

    out = flash_attention(q, k, v).reshape(B, H, T, D)

    # Exact PyTorch: out.transpose(-2, -1).contiguous().view(B, T, C)
    # (swaps seq_len and head_dim — reproduced faithfully from the source).
    out = jnp.transpose(out, (0, 1, 3, 2)).reshape(B, T, C)

    out2d = linear_pallas(out.reshape(B * T, C), params["Wp"], params["bp"])
    return out2d.reshape(B, T, C)


def reference_jax(x, params, n_head):
    """Pure-JAX reference for correctness checking."""
    B, T, C = x.shape
    D = C // n_head

    def lin(t, W, b):
        return t @ W.T + b

    k = lin(x, params["Wk"], params["bk"]).reshape(B, T, n_head, D).transpose(0, 2, 1, 3)
    q = lin(x, params["Wq"], params["bq"]).reshape(B, T, n_head, D).transpose(0, 2, 1, 3)
    v = lin(x, params["Wv"], params["bv"]).reshape(B, T, n_head, D).transpose(0, 2, 1, 3)

    attn = jnp.einsum("bhtd,bhsd->bhts", q, k) * (1.0 / math.sqrt(D))
    mask = jnp.tril(jnp.ones((T, T)))[None, None]
    attn = jnp.where(mask == 0.0, -jnp.inf, attn)
    attn = jax.nn.softmax(attn, axis=-1)
    out = jnp.einsum("bhts,bhsd->bhtd", attn, v)
    out = jnp.transpose(out, (0, 1, 3, 2)).reshape(B, T, C)
    return lin(out, params["Wp"], params["bp"])


# ---------------------------------------------------------------------------
# Main
# ---------------------------------------------------------------------------

if __name__ == "__main__":
    B, T, d_model, n_head = 2, 8, 32, 4
    assert d_model % n_head == 0

    key = jax.random.PRNGKey(0)
    keys = jax.random.split(key, 9)

    def w_init(k):
        return (0.02 * jax.random.normal(k, (d_model, d_model))).astype(jnp.float32)

    def b_init(k):
        return (0.02 * jax.random.normal(k, (d_model,))).astype(jnp.float32)

    params = {
        "Wk": w_init(keys[0]), "bk": b_init(keys[1]),
        "Wq": w_init(keys[2]), "bq": b_init(keys[3]),
        "Wv": w_init(keys[4]), "bv": b_init(keys[5]),
        "Wp": w_init(keys[6]), "bp": b_init(keys[7]),
    }

    x = jax.random.normal(keys[8], (B, T, d_model), dtype=jnp.float32)

    out = causal_self_attention(x, params, n_head)
    out = jax.block_until_ready(out)

    ref = jax.block_until_ready(reference_jax(x, params, n_head))
    assert out.shape == (B, T, d_model)
    # Tolerance accounts for the approx-reciprocal normalisation (EUP) and the
    # MXU's multi-pass handling of f32 matmuls vs. the XLA reference einsums.
    assert jnp.allclose(out, ref, atol=5e-3, rtol=5e-3), "mismatch vs reference"

    print("KERNEL_OK")
</pallas_src>

<mosaic_0001>
module attributes {stable_mosaic.version = 11 : i64} {
  func.func @_linear_kernel(%arg0: i32, %arg1: i32, %arg2: i32, %arg3: memref<16x32xf32, #tpu.memory_space<vmem>>, %arg4: memref<96x32xf32, #tpu.memory_space<vmem>>, %arg5: memref<1x96xf32, #tpu.memory_space<vmem>>, %arg6: memref<16x96xf32, #tpu.memory_space<vmem>>, %arg7: memref<16x96xf32, #tpu.memory_space<vmem>>) attributes {dimension_semantics = [#tpu.dimension_semantics<parallel>, #tpu.dimension_semantics<parallel>, #tpu.dimension_semantics<arbitrary>], iteration_bounds = array<i64: 1, 1, 1>, scalar_prefetch = 0 : i64, scratch_operands = 1 : i64, tpu.core_type = #tpu.core_type<tc>, window_params = [{transform_indices = @transform_0, window_bounds = array<i64: 16, 32>}, {transform_indices = @transform_1, window_bounds = array<i64: 96, 32>}, {transform_indices = @transform_2, window_bounds = array<i64: 1, 96>}, {transform_indices = @transform_3, window_bounds = array<i64: 16, 96>}]} {
    %c0_i32 = arith.constant 0 : i32
    %0 = arith.cmpi eq, %arg2, %c0_i32 : i32
    %1 = arith.extui %0 : i1 to i32
    %c0_i32_0 = arith.constant 0 : i32
    %2 = arith.cmpi ne, %1, %c0_i32_0 : i32
    scf.if %2 {
      %cst_10 = arith.constant 0.000000e+00 : f32
      %12 = vector.broadcast %cst_10 : f32 to vector<16x96xf32>
      %c0_11 = arith.constant 0 : index
      %c0_12 = arith.constant 0 : index
      %13 = vector.load %arg7[%c0_11, %c0_12] : memref<16x96xf32, #tpu.memory_space<vmem>>, vector<16x96xf32>
      tpu.vector_store %arg7[%c0_11, %c0_12], %12 {strides = array<i32>} : memref<16x96xf32, #tpu.memory_space<vmem>>, vector<16x96xf32>,
    } else {
    }
    %c0 = arith.constant 0 : index
    %c0_1 = arith.constant 0 : index
    %3 = vector.load %arg7[%c0, %c0_1] : memref<16x96xf32, #tpu.memory_space<vmem>>, vector<16x96xf32>
    %c0_2 = arith.constant 0 : index
    %c0_3 = arith.constant 0 : index
    %4 = vector.load %arg3[%c0_2, %c0_3] : memref<16x32xf32, #tpu.memory_space<vmem>>, vector<16x32xf32>
    %c0_4 = arith.constant 0 : index
    %c0_5 = arith.constant 0 : index
    %5 = vector.load %arg4[%c0_4, %c0_5] : memref<96x32xf32, #tpu.memory_space<vmem>>, vector<96x32xf32>
    %cst = arith.constant dense<0.000000e+00> : vector<16x96xf32>
    %6 = tpu.matmul %4, %5, %cst {dimension_numbers = #tpu.dot_dimension_numbers<[1], [1], [0], [0], [0, 0, 1, 0], [], []>} : vector<16x32xf32>, vector<96x32xf32>, vector<16x96xf32> -> vector<16x96xf32>
    %7 = arith.addf %3, %6 : vector<16x96xf32>
    %c0_6 = arith.constant 0 : index
    %c0_7 = arith.constant 0 : index
    %8 = vector.load %arg7[%c0_6, %c0_7] : memref<16x96xf32, #tpu.memory_space<vmem>>, vector<16x96xf32>
    tpu.vector_store %arg7[%c0_6, %c0_7], %7 {strides = array<i32>} : memref<16x96xf32, #tpu.memory_space<vmem>>, vector<16x96xf32>,
    %c0_i32_8 = arith.constant 0 : i32
    %9 = arith.cmpi eq, %arg2, %c0_i32_8 : i32
    %10 = arith.extui %9 : i1 to i32
    %c0_i32_9 = arith.constant 0 : i32
    %11 = arith.cmpi ne, %10, %c0_i32_9 : i32
    scf.if %11 {
      %c0_10 = arith.constant 0 : index
      %c0_11 = arith.constant 0 : index
      %12 = vector.load %arg7[%c0_10, %c0_11] : memref<16x96xf32, #tpu.memory_space<vmem>>, vector<16x96xf32>
      %c0_12 = arith.constant 0 : index
      %c0_13 = arith.constant 0 : index
      %13 = vector.load %arg5[%c0_12, %c0_13] : memref<1x96xf32, #tpu.memory_space<vmem>>, vector<1x96xf32>
      %14 = vector.broadcast %13 : vector<1x96xf32> to vector<16x96xf32>
      %15 = arith.addf %12, %14 : vector<16x96xf32>
      %c0_14 = arith.constant 0 : index
      %c0_15 = arith.constant 0 : index
      %16 = vector.load %arg6[%c0_14, %c0_15] : memref<16x96xf32, #tpu.memory_space<vmem>>, vector<16x96xf32>
      tpu.vector_store %arg6[%c0_14, %c0_15], %15 {strides = array<i32>} : memref<16x96xf32, #tpu.memory_space<vmem>>, vector<16x96xf32>,
    } else {
    }
    return
  }
  func.func @transform_0(%arg0: i32, %arg1: i32, %arg2: i32) -> (i32, i32) {
    %c0_i32 = arith.constant 0 : i32
    return %arg0, %arg2 : i32, i32
  }
  func.func @transform_1(%arg0: i32, %arg1: i32, %arg2: i32) -> (i32, i32) {
    %c0_i32 = arith.constant 0 : i32
    return %arg1, %arg2 : i32, i32
  }
  func.func @transform_2(%arg0: i32, %arg1: i32, %arg2: i32) -> (i32, i32) {
    %c0_i32 = arith.constant 0 : i32
    %c0_i32_0 = arith.constant 0 : i32
    return %c0_i32, %arg1 : i32, i32
  }
  func.func @transform_3(%arg0: i32, %arg1: i32, %arg2: i32) -> (i32, i32) {
    %c0_i32 = arith.constant 0 : i32
    return %arg0, %arg1 : i32, i32
  }
}

</mosaic_0001>

<bundles_post_ra>
// kernel: tpu_custom_call.1
= control target key start
LH: loop header
LB: loop body
LE: loop exit
PB: predicated region body
PF: predicated region fallthrough
CT: control target
= control target key end

     0   :  { %vm38_vm0 = vcmask 261120   ;;  %vm19_vm1 = vcmask 785408   ;;  %v313_v6 = vmov 0.0   ;;  %s432_s0 = inlined_call_operand.vmem [shape: f32[16,32], index: 0, kind: input, shape index: {}]   ;;  %s433_s1 = inlined_call_operand.vmem [shape: f32[96,32], index: 1, kind: input, shape index: {}]   ;;  %s434_s2 = inlined_call_operand.vmem [shape: f32[1,96], index: 2, kind: input, shape index: {}]   ;;  %s435_s3 = inlined_call_operand.hbm [shape: f32[16,96], index: 3, kind: output, shape index: {}]  }
   0x1   :  { %v26_v0 = vld [vmem:[%s433_s1] sm:$0xff]  ;;  %v27_v1 = vld [vmem:[%s433_s1 + $0x8] sm:$0xff]  ;;  %v28_v2 = vld [vmem:[%s433_s1 + $0x10] sm:$0xff]  ;;  %21 = vst.msk [vmem:[#allocation2 + $0x8] sm:$0xff] %vm19_vm1, %v313_v6 }
   0x2   :  { %v249_v3 = vpack.c.bf16 %v27_v1, %v26_v0  ;;  %vm348_vm2 = vmpackc.low %vm38_vm0, %vm38_vm0  ;;  %v29_v5 = vld [vmem:[%s433_s1 + $0x18] sm:$0xff]  ;;  %20 = vst.msk [vmem:[#allocation2] sm:$0xff] %vm19_vm1, %v313_v6  ;;  %v24_v8 = vld [vmem:[%s432_s0] sm:$0xff] }
   0x3   :  { %v255_v7 = vpack.c.bf16 %v29_v5, %v28_v2  ;;  %246 = vmatprep.mubr.msk.f32.mxu0 %vm38_vm0, %v24_v8 }
   0x4   :  { %251 = vmatprep.subr.msk.bf16.mxu0 %vm348_vm2, %v249_v3 }
   0x5   :  { %254 = vmatpush3.bf16.xpose.msk.msra.mxu0 %vm348_vm2, %v249_v3 }
   0x6   :  { %257 = vmatprep.subr.msk.bf16.mxu0 %vm348_vm2, %v255_v7 }
   0x7   :  { %8 = vsyncpa [#allocation4], 0  ;;  %v30_v9 = vld [vmem:[%s433_s1 + $0x20] sm:$0xff]  ;;  %v31_v10 = vld [vmem:[%s433_s1 + $0x28] sm:$0xff]  ;;  %s314_s14 = smov [#allocation3]  }
   0x8   :  { %v261_v11 = vpack.c.bf16 %v31_v10, %v30_v9  ;;  %v32_v12 = vld [vmem:[%s433_s1 + $0x30] sm:$0xff]  ;;  %v33_v13 = vld [vmem:[%s433_s1 + $0x38] sm:$0xff]  ;;  %v34_v15 = vld [vmem:[%s433_s1 + $0x40] sm:$0xff]  ;;  %s182_s15 = sshll.u32 %s314_s14, 4  ;;  %s183_s15 = int_to_ptr.vmem [resolvable:$true] %s182_s15 }
   0x9   :  { %v267_v14 = vpack.c.bf16 %v33_v13, %v32_v12  ;;  %v35_v16 = vld [vmem:[%s433_s1 + $0x48] sm:$0xff]  ;;  %v36_v18 = vld [vmem:[%s433_s1 + $0x50] sm:$0xff]  ;;  %v37_v19 = vld [vmem:[%s433_s1 + $0x58] sm:$0xff]  ;;  %p294_p1 = scmp.lt.s32.totalorder %s183_s15, %s183_s15 }
   0xa   :  { %v273_v17 = vpack.c.bf16 %v35_v16, %v34_v15  ;;  %v279_v20 = vpack.c.bf16 %v37_v19, %v36_v18  ;;  %v25_v21 = vld [vmem:[%s432_s0 + $0x8] sm:$0xff]  ;;  %v22_v23 = vld [vmem:[#allocation2] sm:$0xff]  ;;  %s289_s0 = scalar_lea.vmem %s183_s15, 256 }
   0xb   :  { %v23_v22 = vld [vmem:[#allocation2 + $0x8] sm:$0xff]  ;;  %v207_v28 = vld [vmem:[%s434_s2] ss:$0 sm:$0xff]  ;;  %p290_p0 = scmp.ne.s32.totalorder %s183_s15, %s289_s0  ;;  %p295_p2 = scmp.lt.s32.totalorder %s289_s0, %s289_s0 }
   0xd   :  { %260 = vmatpush3.bf16.xpose.msk.msra.mxu0 %vm348_vm2, %v255_v7  ;;  %p296_p3 = por %p295_p2, %p294_p1 }
   0xe   :  { %263 = vmatprep.subr.msk.bf16.mxu0 %vm348_vm2, %v261_v11 }
   0xf   :  { %p297_p4 = pnand %p296_p3, %p290_p0 }
  0x15   :  { %266 = vmatpush3.bf16.xpose.msk.msra.mxu0 %vm348_vm2, %v261_v11 }
  0x16   :  { %269 = vmatprep.subr.msk.bf16.mxu0 %vm348_vm2, %v267_v14 }
  0x1d   :  { %272 = vmatpush3.bf16.xpose.msk.msra.mxu0 %vm348_vm2, %v267_v14 }
  0x1e   :  { %275 = vmatprep.subr.msk.bf16.mxu0 %vm348_vm2, %v273_v17 }
  0x25   :  { %278 = vmatpush3.bf16.xpose.msk.msra.mxu0 %vm348_vm2, %v273_v17 }
  0x26   :  { %281 = vmatprep.subr.msk.bf16.mxu0 %vm348_vm2, %v279_v20 }
  0x2d   :  { %284 = vmatpush3.bf16.xpose.msk.msra.mxu0 %vm348_vm2, %v279_v20 }
  0x34   :  { %247 = vmatmul.mubr.msk.f32.vlgmr.msra.gmra.mrb[0].mxu0 %vm38_vm0, %v25_v21 }
 0x107   :  { %v248_v24 = vpop.f32.mrb[0].mxu0 }
 0x108   :  { %v157_v25 = vadd.f32 %v248_v24, %v23_v22  ;;  %v147_v26 = vpop.f32.mrb[1].mxu0 }
 0x109   :  { %v156_v27 = vadd.f32 %v147_v26, %v22_v23 }
 0x10a   :  { %160 = vst.msk [vmem:[#allocation2 + $0x8] sm:$0xff] %vm19_vm1, %v157_v25 }
 0x10b   :  { %159 = vst.msk [vmem:[#allocation2] sm:$0xff] %vm19_vm1, %v156_v27 }
 0x111   :  { %v165_v29 = vld [vmem:[#allocation2 + $0x8] sm:$0xff] }
 0x112   :  { %v164_v30 = vld [vmem:[#allocation2] sm:$0xff]  ;;  %v174_v31 = vadd.f32 %v207_v28, %v165_v29 }
 0x113   :  { %v173_v32 = vadd.f32 %v207_v28, %v164_v30 }
 0x114   :  { %176 = vst.msk [vmem:[#allocation3 + $0x8] sm:$0xff] %vm19_vm1, %v174_v31 }
 0x115   :  { %175 = vst.msk [vmem:[#allocation3] sm:$0xff] %vm19_vm1, %v173_v32 }
 0x116   :  { %300 = shalt.err (!%p297_p4)
}
 0x117   :  { %s301_s17 = scalar_lea.hbm %s435_s3, 256 }
 0x118   :  { %p302_p5 = scmp.ne.s32.totalorder %s435_s3, %s301_s17  ;;  %p305_p6 = scmp.lt.u32.totalorder %s301_s17, %s435_s3 }
 0x11a   :  { %p307_p7 = pnand %p305_p6, %p302_p5 }
 0x11c   :  { %310 = shalt.err (!%p307_p7)
}
 0x11d   :  { %s315_s22 = smov 128   ;;  %s316_s23 = smov 8  }
 0x11e   :  { %188 = dma.vmem_to_hbm [thread:$0]  %s183_s15, 256, %s435_s3, [#allocation4], %s315_s22, %s315_s22, %s316_s23  }
 0x11f   :  { %311 = dma.done.wait [#allocation4], 256  }
 0x120   :  { %312 = vsyncadd [#allocation4], 4294967040 }
 0x121   :  { %192 = vsyncpa [#allocation4], 1 }

</bundles_post_ra>
